<compile_context>
chip_gen: v7x
topology: tpu7x:2x2x1
jax: 0.10.0
libtpu: 0.0.40
codegen_flags: <defaults>
</compile_context>

<pallas_src>
import math

import jax
import jax.numpy as jnp
from jax.experimental import pallas as pl
from jax.experimental.pallas import tpu as pltpu


def _qkv_lora_kernel(x_ref, wt_ref, bias_ref, mid_ref, b_ref, o_ref, acc_ref):
    """Grid = (i: rows, j: output cols, k: D_in reduction).
       acc[i, j] = sum_k x[i, k-tile] @ W^T[k-tile, j-tile]
       epilogue (k == last): + bias[j-tile] + mid[i-tile] @ B_fused[:, j-tile]
       mid already contains (dropout(x) @ A_fused) * scaling, precomputed in f32.
    """
    k = pl.program_id(2)

    @pl.when(k == 0)
    def _():
        acc_ref[...] = jnp.zeros_like(acc_ref)

    # Base fused-QKV matmul: native-dtype operands on the MXU, f32 accumulate.
    acc_ref[...] += jnp.dot(x_ref[...], wt_ref[...],
                            preferred_element_type=jnp.float32)

    @pl.when(k == pl.num_programs(2) - 1)
    def _():
        acc = acc_ref[...]
        acc = acc + bias_ref[...].astype(jnp.float32)
        # Fused q+v LoRA epilogue (k columns of B_fused are zero): tiny (2r) K dim.
        acc = acc + jnp.dot(mid_ref[...], b_ref[...],
                            preferred_element_type=jnp.float32)
        o_ref[...] = acc.astype(o_ref.dtype)


def _pick_tile(dim, candidates):
    """Largest candidate that evenly divides `dim`; otherwise the full dim
    (full-extent blocks are always legal)."""
    for t in candidates:
        if dim >= t and dim % t == 0:
            return t
    return dim


def _vmem_physical_bytes():
    """Per-TensorCore VMEM capacity; conservative default if unavailable."""
    try:
        info = pltpu.get_tpu_info()
        cap = getattr(info, "vmem_capacity_bytes", None)
        if cap:
            return int(cap)
    except Exception:
        pass
    return 64 * 1024 * 1024  # assume the smallest (v7x) if we cannot query


def qkv_linear_lora(x, weight, bias, lora_A_q, lora_B_q, lora_A_v, lora_B_v,
                    *, lora_alpha, r, tile_m=None, tile_n=None, tile_k=None):
    """x: [B, S, D_in]; weight: [3*b_dim, D_in]; bias: [3*b_dim] or None;
       lora_A_*: [r, D_in]; lora_B_*: [b_dim, r].  Returns [B, S, 3*b_dim]."""
    B, S, D_in = x.shape
    D_out = weight.shape[0]
    assert D_out % 3 == 0
    b_dim = D_out // 3
    scaling = lora_alpha / r
    M = B * S
    r2 = 2 * r

    # Tile selection: MXU/lane aligned for real model shapes, full extents for
    # tiny shapes (always-legal BlockSpecs).  tile_n multiples of 256/128 only.
    if tile_m is None:
        tile_m = _pick_tile(M, (1024, 512, 256, 128))
    if tile_n is None:
        tile_n = _pick_tile(D_out, (512, 256, 128))
    if tile_k is None:
        tile_k = _pick_tile(D_in, (1024, 512, 256))
    assert M % tile_m == 0 and D_out % tile_n == 0 and D_in % tile_k == 0

    x2 = x.reshape(M, D_in)
    wt = weight.T                                  # [D_in, D_out]
    if bias is None:
        bias = jnp.zeros((D_out,), dtype=weight.dtype)
    bias2 = bias.reshape(1, D_out)

    # --- LoRA precompute (wrapper; runs once per call, plain XLA) -----------
    # A_fused = [A_q^T | A_v^T] : (D_in, 2r).  mid = (x @ A_fused) * scaling is
    # computed in f32 (scaling applied before the low-precision cast), hoisted
    # out of the kernel entirely so it is NOT recomputed per output-column tile.
    # TODO(synk): lora_dropout > 0 (training-time dropout on the LoRA input) is
    # not implemented; the module default p=0.0 makes it the identity.
    a_fused = jnp.concatenate([lora_A_q.T, lora_A_v.T], axis=1).astype(x.dtype)
    mid = (jnp.dot(x2, a_fused, preferred_element_type=jnp.float32)
           * jnp.float32(scaling)).astype(x.dtype)                    # [M, 2r]

    # Block-structured B_fused (2r, D_out): q rows feed the q slice, v rows feed
    # the v slice, k columns stay zero (no scaling here — already folded in f32).
    b_fused = jnp.zeros((r2, D_out), dtype=weight.dtype)
    b_fused = b_fused.at[:r, :b_dim].set(lora_B_q.T.astype(weight.dtype))
    b_fused = b_fused.at[r:, 2 * b_dim:].set(lora_B_v.T.astype(weight.dtype))

    # --- VMEM budget (bounded by tiles, independent of D_in thanks to K axis) --
    x_item = jnp.dtype(x.dtype).itemsize
    w_item = jnp.dtype(weight.dtype).itemsize
    o_item = jnp.dtype(x.dtype).itemsize
    est = (2 * tile_m * tile_k * x_item            # x tile (double buffered)
           + 2 * tile_k * tile_n * w_item          # W^T tile
           + 2 * tile_n * w_item                   # bias tile
           + 2 * tile_m * r2 * x_item              # mid tile
           + 2 * r2 * tile_n * w_item              # B_fused tile
           + 2 * tile_m * tile_n * o_item          # output tile
           + tile_m * tile_n * 4)                  # f32 accumulator scratch
    physical = _vmem_physical_bytes()
    if physical <= 64 * 1024 * 1024:               # v7x-class: leave headroom
        clamp_hi = 56 * 1024 * 1024
    else:                                          # v5e/v6e: 128 MiB physical
        clamp_hi = 96 * 1024 * 1024
    vmem_bytes = int(min(max(2 * est, 32 * 1024 * 1024), clamp_hi))

    grid = (M // tile_m, D_out // tile_n, D_in // tile_k)

    flops = 2 * M * D_in * D_out + 2 * M * r2 * D_out
    bytes_accessed = (M * D_in * x_item + D_in * D_out * w_item
                      + D_out * w_item + M * r2 * x_item
                      + r2 * D_out * w_item + M * D_out * o_item)

    out2 = pl.pallas_call(
        _qkv_lora_kernel,
        out_shape=jax.ShapeDtypeStruct((M, D_out), x.dtype),
        grid_spec=pltpu.PrefetchScalarGridSpec(
            num_scalar_prefetch=0,
            grid=grid,
            in_specs=[
                pl.BlockSpec((tile_m, tile_k), lambda i, j, k: (i, k)),   # x
                pl.BlockSpec((tile_k, tile_n), lambda i, j, k: (k, j)),   # W^T
                pl.BlockSpec((1, tile_n),      lambda i, j, k: (0, j)),   # bias
                pl.BlockSpec((tile_m, r2),     lambda i, j, k: (i, 0)),   # mid
                pl.BlockSpec((r2, tile_n),     lambda i, j, k: (0, j)),   # B_fused
            ],
            out_specs=pl.BlockSpec((tile_m, tile_n), lambda i, j, k: (i, j)),
            scratch_shapes=[pltpu.VMEM((tile_m, tile_n), jnp.float32)],
        ),
        compiler_params=pltpu.CompilerParams(
            dimension_semantics=("parallel", "parallel", "arbitrary"),
            vmem_limit_bytes=vmem_bytes),
        cost_estimate=pl.CostEstimate(flops=flops, transcendentals=0,
                                      bytes_accessed=bytes_accessed),
    )(x2, wt, bias2, mid, b_fused)

    return out2.reshape(B, S, D_out)


def _kaiming_uniform(key, shape, fan_in, a=math.sqrt(5.0)):
    # matches nn.init.kaiming_uniform_(p, a=sqrt(5)): bound = sqrt(6/((1+a^2)*fan_in))
    gain = math.sqrt(2.0 / (1.0 + a * a))
    bound = gain * math.sqrt(3.0 / fan_in)
    return jax.random.uniform(key, shape, jnp.float32, -bound, bound)


if __name__ == "__main__":
    # Small, module-consistent shapes: batch=2, seq=8, in_features=32,
    # out_features = 3*b_dim = 96, LoRA rank r=4, lora_alpha=1, dropout=0.0.
    B, S, D_in = 2, 8, 32
    b_dim = 32
    D_out = 3 * b_dim
    r, lora_alpha = 4, 1

    key = jax.random.PRNGKey(0)
    kx, kw, kb, kaq, kbq, kav, kbv = jax.random.split(key, 7)

    x = jax.random.normal(kx, (B, S, D_in), jnp.float32)

    # fc = nn.Linear(D_in, D_out): default torch init uniform(-1/sqrt(D_in), 1/sqrt(D_in))
    lin_bound = 1.0 / math.sqrt(D_in)
    weight = jax.random.uniform(kw, (D_out, D_in), jnp.float32, -lin_bound, lin_bound)
    bias = jax.random.uniform(kb, (D_out,), jnp.float32, -lin_bound, lin_bound)

    # LoRA params (weight_types='qv'); zero_init=False so the LoRA path is exercised.
    lora_A_q = _kaiming_uniform(kaq, (r, D_in), fan_in=D_in)
    lora_B_q = _kaiming_uniform(kbq, (b_dim, r), fan_in=r)
    lora_A_v = _kaiming_uniform(kav, (r, D_in), fan_in=D_in)
    lora_B_v = _kaiming_uniform(kbv, (b_dim, r), fan_in=r)

    out = qkv_linear_lora(x, weight, bias, lora_A_q, lora_B_q, lora_A_v, lora_B_v,
                          lora_alpha=lora_alpha, r=r)
    out = jax.block_until_ready(out)

    # Pure-JAX reference (same math as the PyTorch forward; dropout p=0 is identity).
    scaling = lora_alpha / r
    ref = jnp.einsum("bsd,od->bso", x, weight) + bias
    ref = ref.at[:, :, :b_dim].add((x @ lora_A_q.T @ lora_B_q.T) * scaling)
    ref = ref.at[:, :, 2 * b_dim:].add((x @ lora_A_v.T @ lora_B_v.T) * scaling)

    assert out.shape == (B, S, D_out)
    assert jnp.allclose(out, ref, atol=1e-4, rtol=1e-4), float(jnp.abs(out - ref).max())
    print("KERNEL_OK")
</pallas_src>

<mosaic_0001>
module attributes {stable_mosaic.version = 11 : i64} {
  func.func @_qkv_lora_kernel(%arg0: i32, %arg1: i32, %arg2: i32, %arg3: memref<16x32xf32, #tpu.memory_space<vmem>>, %arg4: memref<32x96xf32, #tpu.memory_space<vmem>>, %arg5: memref<1x96xf32, #tpu.memory_space<vmem>>, %arg6: memref<16x8xf32, #tpu.memory_space<vmem>>, %arg7: memref<8x96xf32, #tpu.memory_space<vmem>>, %arg8: memref<16x96xf32, #tpu.memory_space<vmem>>, %arg9: memref<16x96xf32, #tpu.memory_space<vmem>>) attributes {dimension_semantics = [#tpu.dimension_semantics<parallel>, #tpu.dimension_semantics<parallel>, #tpu.dimension_semantics<arbitrary>], iteration_bounds = array<i64: 1, 1, 1>, scalar_prefetch = 0 : i64, scratch_operands = 1 : i64, tpu.core_type = #tpu.core_type<tc>, window_params = [{transform_indices = @transform_0, window_bounds = array<i64: 16, 32>}, {transform_indices = @transform_1, window_bounds = array<i64: 32, 96>}, {transform_indices = @transform_2, window_bounds = array<i64: 1, 96>}, {transform_indices = @transform_3, window_bounds = array<i64: 16, 8>}, {transform_indices = @transform_4, window_bounds = array<i64: 8, 96>}, {transform_indices = @transform_5, window_bounds = array<i64: 16, 96>}]} {
    %c0_i32 = arith.constant 0 : i32
    %0 = arith.cmpi eq, %arg2, %c0_i32 : i32
    %1 = arith.extui %0 : i1 to i32
    %c0_i32_0 = arith.constant 0 : i32
    %2 = arith.cmpi ne, %1, %c0_i32_0 : i32
    scf.if %2 {
      %cst_10 = arith.constant 0.000000e+00 : f32
      %12 = vector.broadcast %cst_10 : f32 to vector<16x96xf32>
      %c0_11 = arith.constant 0 : index
      %c0_12 = arith.constant 0 : index
      %13 = vector.load %arg9[%c0_11, %c0_12] : memref<16x96xf32, #tpu.memory_space<vmem>>, vector<16x96xf32>
      tpu.vector_store %arg9[%c0_11, %c0_12], %12 {strides = array<i32>} : memref<16x96xf32, #tpu.memory_space<vmem>>, vector<16x96xf32>,
    } else {
    }
    %c0 = arith.constant 0 : index
    %c0_1 = arith.constant 0 : index
    %3 = vector.load %arg9[%c0, %c0_1] : memref<16x96xf32, #tpu.memory_space<vmem>>, vector<16x96xf32>
    %c0_2 = arith.constant 0 : index
    %c0_3 = arith.constant 0 : index
    %4 = vector.load %arg3[%c0_2, %c0_3] : memref<16x32xf32, #tpu.memory_space<vmem>>, vector<16x32xf32>
    %c0_4 = arith.constant 0 : index
    %c0_5 = arith.constant 0 : index
    %5 = vector.load %arg4[%c0_4, %c0_5] : memref<32x96xf32, #tpu.memory_space<vmem>>, vector<32x96xf32>
    %cst = arith.constant dense<0.000000e+00> : vector<16x96xf32>
    %6 = tpu.matmul %4, %5, %cst {dimension_numbers = #tpu.dot_dimension_numbers<[1], [0], [0], [1], [0, 0, 1, 1], [], []>} : vector<16x32xf32>, vector<32x96xf32>, vector<16x96xf32> -> vector<16x96xf32>
    %7 = arith.addf %3, %6 : vector<16x96xf32>
    %c0_6 = arith.constant 0 : index
    %c0_7 = arith.constant 0 : index
    %8 = vector.load %arg9[%c0_6, %c0_7] : memref<16x96xf32, #tpu.memory_space<vmem>>, vector<16x96xf32>
    tpu.vector_store %arg9[%c0_6, %c0_7], %7 {strides = array<i32>} : memref<16x96xf32, #tpu.memory_space<vmem>>, vector<16x96xf32>,
    %c0_i32_8 = arith.constant 0 : i32
    %9 = arith.cmpi eq, %arg2, %c0_i32_8 : i32
    %10 = arith.extui %9 : i1 to i32
    %c0_i32_9 = arith.constant 0 : i32
    %11 = arith.cmpi ne, %10, %c0_i32_9 : i32
    scf.if %11 {
      %c0_10 = arith.constant 0 : index
      %c0_11 = arith.constant 0 : index
      %12 = vector.load %arg9[%c0_10, %c0_11] : memref<16x96xf32, #tpu.memory_space<vmem>>, vector<16x96xf32>
      %c0_12 = arith.constant 0 : index
      %c0_13 = arith.constant 0 : index
      %13 = vector.load %arg5[%c0_12, %c0_13] : memref<1x96xf32, #tpu.memory_space<vmem>>, vector<1x96xf32>
      %14 = vector.broadcast %13 : vector<1x96xf32> to vector<16x96xf32>
      %15 = arith.addf %12, %14 : vector<16x96xf32>
      %c0_14 = arith.constant 0 : index
      %c0_15 = arith.constant 0 : index
      %16 = vector.load %arg6[%c0_14, %c0_15] : memref<16x8xf32, #tpu.memory_space<vmem>>, vector<16x8xf32>
      %c0_16 = arith.constant 0 : index
      %c0_17 = arith.constant 0 : index
      %17 = vector.load %arg7[%c0_16, %c0_17] : memref<8x96xf32, #tpu.memory_space<vmem>>, vector<8x96xf32>
      %cst_18 = arith.constant dense<0.000000e+00> : vector<16x96xf32>
      %18 = tpu.matmul %16, %17, %cst_18 {dimension_numbers = #tpu.dot_dimension_numbers<[1], [0], [0], [1], [0, 0, 1, 1], [], []>} : vector<16x8xf32>, vector<8x96xf32>, vector<16x96xf32> -> vector<16x96xf32>
      %19 = arith.addf %15, %18 : vector<16x96xf32>
      %c0_19 = arith.constant 0 : index
      %c0_20 = arith.constant 0 : index
      %20 = vector.load %arg8[%c0_19, %c0_20] : memref<16x96xf32, #tpu.memory_space<vmem>>, vector<16x96xf32>
      tpu.vector_store %arg8[%c0_19, %c0_20], %19 {strides = array<i32>} : memref<16x96xf32, #tpu.memory_space<vmem>>, vector<16x96xf32>,
    } else {
    }
    return
  }
  func.func @transform_0(%arg0: i32, %arg1: i32, %arg2: i32) -> (i32, i32) {
    %c0_i32 = arith.constant 0 : i32
    return %arg0, %arg2 : i32, i32
  }
  func.func @transform_1(%arg0: i32, %arg1: i32, %arg2: i32) -> (i32, i32) {
    %c0_i32 = arith.constant 0 : i32
    return %arg2, %arg1 : i32, i32
  }
  func.func @transform_2(%arg0: i32, %arg1: i32, %arg2: i32) -> (i32, i32) {
    %c0_i32 = arith.constant 0 : i32
    %c0_i32_0 = arith.constant 0 : i32
    return %c0_i32, %arg1 : i32, i32
  }
  func.func @transform_3(%arg0: i32, %arg1: i32, %arg2: i32) -> (i32, i32) {
    %c0_i32 = arith.constant 0 : i32
    %c0_i32_0 = arith.constant 0 : i32
    return %arg0, %c0_i32 : i32, i32
  }
  func.func @transform_4(%arg0: i32, %arg1: i32, %arg2: i32) -> (i32, i32) {
    %c0_i32 = arith.constant 0 : i32
    %c0_i32_0 = arith.constant 0 : i32
    return %c0_i32, %arg1 : i32, i32
  }
  func.func @transform_5(%arg0: i32, %arg1: i32, %arg2: i32) -> (i32, i32) {
    %c0_i32 = arith.constant 0 : i32
    return %arg0, %arg1 : i32, i32
  }
}

</mosaic_0001>

<bundles_post_ra>
// kernel: tpu_custom_call.1
= control target key start
LH: loop header
LB: loop body
LE: loop exit
PB: predicated region body
PF: predicated region fallthrough
CT: control target
= control target key end

     0   :  { %10 = vsyncpa [#allocation4], 0  ;;  %s439_s0 = inlined_call_operand.vmem [shape: f32[16,32], index: 0, kind: input, shape index: {}]   ;;  %s440_s1 = inlined_call_operand.hbm [shape: f32[32,96], index: 1, kind: input, shape index: {}]   ;;  %s441_s2 = inlined_call_operand.vmem [shape: f32[1,96], index: 2, kind: input, shape index: {}]   ;;  %s442_s3 = inlined_call_operand.vmem [shape: f32[16,8], index: 3, kind: input, shape index: {}]   ;;  %s443_s4 = inlined_call_operand.vmem [shape: f32[8,96], index: 4, kind: input, shape index: {}]   ;;  %s444_s5 = inlined_call_operand.hbm [shape: f32[16,96], index: 5, kind: output, shape index: {}]  }
   0x1   :  { %11 = vsyncpa [#allocation5], 0  ;;  %s348_s18 = smov [#allocation3]   ;;  %s300_s22 = scalar_lea.hbm %s440_s1, 512 }
   0x2   :  { %s19_s19 = sshll.u32 %s348_s18, 4  ;;  %p301_p0 = scmp.ne.s32.totalorder %s440_s1, %s300_s22  ;;  %s20_s19 = int_to_ptr.vmem [resolvable:$true] %s19_s19 }
   0x3   :  { %p304_p1 = scmp.lt.u32.totalorder %s300_s22, %s440_s1 }
   0x5   :  { %p306_p2 = pnand %p304_p1, %p301_p0 }
   0x7   :  { %309 = shalt.err (!%p306_p2)
}
   0x8   :  { %s310_s27 = scalar_lea.vmem %s20_s19, 512  ;;  %p315_p4 = scmp.lt.s32.totalorder %s20_s19, %s20_s19 }
   0x9   :  { %p311_p3 = scmp.ne.s32.totalorder %s20_s19, %s310_s27  ;;  %p316_p5 = scmp.lt.s32.totalorder %s310_s27, %s310_s27 }
   0xb   :  { %p317_p6 = por %p316_p5, %p315_p4 }
   0xd   :  { %p318_p7 = pnand %p317_p6, %p311_p3 }
   0xf   :  { %321 = shalt.err (!%p318_p7)
}
  0x10   :  { %s349_s28 = smov 128   ;;  %s350_s29 = smov 8  }
  0x11   :  { %25 = dma.hbm_to_vmem [thread:$0]  %s440_s1, 512, %s20_s19, [#allocation4], %s349_s28, %s349_s28, %s350_s29  }
  0x12   :  { %344 = dma.done.wait [#allocation4], 512  }
  0x13   :  { %345 = vsyncadd [#allocation4], 4294966784  ;;  %vm39_vm0 = vcmask 785408   ;;  %v351_v0 = vmov 0.0   ;;  %vm50_vm1 = vcmask 261120   ;;  %v46_v1 = vld [vmem:[#allocation3] sm:$0xff] }
  0x14   :  { %41 = vst.msk [vmem:[#allocation2 + $0x8] sm:$0xff] %vm39_vm0, %v351_v0  ;;  %40 = vst.msk [vmem:[#allocation2] sm:$0xff] %vm39_vm0, %v351_v0  ;;  %v47_v2 = vld [vmem:[#allocation3 + $0x8] sm:$0xff]  ;;  %v48_v3 = vld [vmem:[#allocation3 + $0x10] sm:$0xff]  ;;  %vm154_vm2 = vcmask 64512  }
  0x15   :  { %v287_v4 = vpack.c.bf16 %v47_v2, %v46_v1  ;;  %v49_v5 = vld [vmem:[#allocation3 + $0x18] sm:$0xff]  ;;  %v44_v6 = vld [vmem:[%s439_s0] sm:$0xff] }
  0x16   :  { %v291_v7 = vpack.c.bf16 %v49_v5, %v48_v3  ;;  %279 = vmatprep.mubr.msk.f32.mxu0 %vm50_vm1, %v44_v6  ;;  %v153_v8 = vld [vmem:[%s443_s4] sm:$0xff]  ;;  %v152_v10 = vld [vmem:[%s442_s3 + $0x8] sm:$0xff] }
  0x17   :  { %v151_v9 = vld [vmem:[%s442_s3] sm:$0xff]  ;;  %288 = vmatprep.subr.bf16.mxu0 %v287_v4  ;;  %282 = vmatprep.subr.mxu1 %v153_v8  ;;  %v45_v11 = vld [vmem:[%s439_s0 + $0x8] sm:$0xff]  ;;  %s352_s0 = smov [#allocation6]  }
  0x18   :  { %290 = vmatpush3.bf16.msra.mxu0 %v287_v4  ;;  %283 = vmatpush3.msra.mxu1 %v153_v8  ;;  %v259_v20 = vld [vmem:[%s441_s2] ss:$0 sm:$0xff]  ;;  %s245_s16 = sshll.u32 %s352_s0, 4  ;;  %s246_s16 = int_to_ptr.vmem [resolvable:$true] %s245_s16 }
  0x19   :  { %292 = vmatprep.subr.bf16.mxu0 %v291_v7  ;;  %284 = vmatprep.mubr.msk.f32.mxu1 %vm154_vm2, %v151_v9  ;;  %s322_s17 = scalar_lea.vmem %s246_s16, 256  ;;  %p327_p9 = scmp.lt.s32.totalorder %s246_s16, %s246_s16 }
  0x1a   :  { %285 = vmatmul.mubr.msk.f32.vlgmr.msra.gmra.mrb[0].mxu1 %vm154_vm2, %v152_v10  ;;  %p323_p8 = scmp.ne.s32.totalorder %s246_s16, %s322_s17  ;;  %p328_p10 = scmp.lt.s32.totalorder %s322_s17, %s322_s17 }
  0x1b   :  { %v43_v14 = vld [vmem:[#allocation2 + $0x8] sm:$0xff]  ;;  %v42_v15 = vld [vmem:[#allocation2] sm:$0xff] }
  0x1c   :  { %294 = vmatpush3.bf16.msra.mxu0 %v291_v7  ;;  %p329_p11 = por %p328_p10, %p327_p9 }
  0x1e   :  { %p330_p12 = pnand %p329_p11, %p323_p8 }
  0x1f   :  { %280 = vmatmul.mubr.msk.f32.vlgmr.msra.gmra.mrb[0].mxu0 %vm50_vm1, %v45_v11 }
  0xed   :  { %v286_v12 = vpop.f32.mrb[0].mxu1 }
  0xee   :  { %v227_v13 = vpop.f32.mrb[1].mxu1 }
  0xf2   :  { %v281_v16 = vpop.f32.mrb[0].mxu0 }
  0xf3   :  { %v133_v17 = vadd.f32 %v281_v16, %v43_v14  ;;  %v123_v18 = vpop.f32.mrb[1].mxu0 }
  0xf4   :  { %v132_v19 = vadd.f32 %v123_v18, %v42_v15 }
  0xf5   :  { %136 = vst.msk [vmem:[#allocation2 + $0x8] sm:$0xff] %vm39_vm0, %v133_v17 }
  0xf6   :  { %135 = vst.msk [vmem:[#allocation2] sm:$0xff] %vm39_vm0, %v132_v19 }
  0xfc   :  { %v141_v21 = vld [vmem:[#allocation2 + $0x8] sm:$0xff] }
  0xfd   :  { %v150_v22 = vadd.f32 %v259_v20, %v141_v21  ;;  %v140_v23 = vld [vmem:[#allocation2] sm:$0xff] }
  0xfe   :  { %v149_v24 = vadd.f32 %v259_v20, %v140_v23 }
  0xff   :  { %v237_v25 = vadd.f32 %v286_v12, %v150_v22 }
 0x100   :  { %v236_v26 = vadd.f32 %v227_v13, %v149_v24 }
 0x101   :  { %239 = vst.msk [vmem:[#allocation6 + $0x8] sm:$0xff] %vm39_vm0, %v237_v25 }
 0x102   :  { %238 = vst.msk [vmem:[#allocation6] sm:$0xff] %vm39_vm0, %v236_v26 }
 0x103   :  { %333 = shalt.err (!%p330_p12)
}
 0x104   :  { %s334_s19 = scalar_lea.hbm %s444_s5, 256 }
 0x105   :  { %p335_p13 = scmp.ne.s32.totalorder %s444_s5, %s334_s19  ;;  %p338_p0 = scmp.lt.u32.totalorder %s334_s19, %s444_s5 }
 0x107   :  { %p340_p1 = pnand %p338_p0, %p335_p13 }
 0x109   :  { %343 = shalt.err (!%p340_p1)
}
 0x10a   :  { %251 = dma.vmem_to_hbm [thread:$0]  %s246_s16, 256, %s444_s5, [#allocation5], %s349_s28, %s349_s28, %s350_s29  }
 0x10b   :  { %346 = dma.done.wait [#allocation5], 256  }
 0x10c   :  { %347 = vsyncadd [#allocation5], 4294967040 }
 0x10d   :  { %255 = vsyncpa [#allocation4], 1 }
 0x10e   :  { %256 = vsyncpa [#allocation5], 1 }

</bundles_post_ra>
